<compile_context>
chip_gen: v7x
topology: tpu7x:2x2x1
jax: 0.10.0
libtpu: 0.0.40
codegen_flags: <defaults>
</compile_context>

<pallas_src>
import jax
import jax.numpy as jnp
import numpy as np
from jax.experimental import pallas as pl
from jax.experimental.pallas import tpu as pltpu

# ---- small synthetic shapes consistent with the forward pass ----
B = 2            # batch
C = 4            # image channels
H = W = 16       # image spatial
S = 8            # text sequence length
D = 32           # embedding / hidden dim
V = 64           # vocab size
COUT = 8         # conv output channels
KH = KW = 3
K = KH * KW * C  # im2col feature dim = 36
HW = H * W       # 256


def fusion_kernel(patches_ref, wconv_ref, emb_ref, mask_ref, dist_ref,
                  pvec_ref, scal_ref, logits_ref):
    # packed parameter rows (single (3,128) VMEM tile):
    #   row 0 lanes[0:COUT] = conv bias, row 1 lanes[0:COUT] = cnn-head weight,
    #   row 2 lanes[0:D]    = llm-head weight
    bconv = pvec_ref[0:1, 0:COUT]                                   # (1, COUT)
    wcnn = pvec_ref[1:2, 0:COUT]                                    # (1, COUT)
    wllm = pvec_ref[2:3, 0:D]                                       # (1, D)
    # packed SMEM scalars: [b_cnn, b_llm, wf_dist, wf_cnn, wf_llm, b_fusion, 0, 0]

    # ---- CNN branch: one batched conv-as-im2col matmul (MXU) + ReLU + avg pool ----
    y = jnp.dot(patches_ref[...], wconv_ref[...],
                preferred_element_type=jnp.float32) + bconv         # (B*HW, COUT)
    y = jnp.maximum(y, 0.0)
    cnn_feat = jnp.mean(y.reshape(B, HW, COUT), axis=1)             # (B, COUT) in vregs
    cnn_logits = (jnp.sum(cnn_feat * wcnn, axis=1, keepdims=True)
                  + scal_ref[0])                                    # (B, 1)

    # ---- LLM (reader) branch: masked mean pool over sequence + Linear(D, 1) ----
    emb = emb_ref[...]                                              # (B, S, D)
    mask = mask_ref[...]                                            # (B, S, 1)
    denom = jnp.maximum(jnp.sum(mask, axis=1), 1.0)                 # (B, 1)
    pooled = jnp.sum(emb * mask, axis=1) / denom                    # (B, D)
    llm_logits = (jnp.sum(pooled * wllm, axis=1, keepdims=True)
                  + scal_ref[1])                                    # (B, 1)

    # ---- Fusion MLP = Linear(3, 1) over cat([distance, cnn_logits, llm_logits]) ----
    logits_ref[...] = (dist_ref[...] * scal_ref[2]
                       + cnn_logits * scal_ref[3]
                       + llm_logits * scal_ref[4]
                       + scal_ref[5])                               # (B, 1)


def im2col(x_nhwc):
    """(B, H, W, C) -> (B*H*W, 9*C) patches for a 3x3 'same' conv (wrapper glue)."""
    xp = jnp.pad(x_nhwc, ((0, 0), (1, 1), (1, 1), (0, 0)))
    cols = []
    for kh in range(KH):
        for kw in range(KW):
            cols.append(xp[:, kh:kh + H, kw:kw + W, :])
    patches = jnp.concatenate(cols, axis=-1)                        # (B, H, W, K)
    return patches.reshape(B * HW, K)


def init_params(key):
    ks = jax.random.split(key, 8)
    return {
        "emb_table":  jax.random.normal(ks[0], (V, D), jnp.float32) * 0.1,
        "w_conv":     jax.random.normal(ks[1], (KH, KW, C, COUT), jnp.float32) * 0.1,
        "b_conv":     jnp.zeros((COUT,), jnp.float32),
        "w_cnn_head": jax.random.normal(ks[2], (1, COUT), jnp.float32) * 0.1,  # torch (out,in)
        "b_cnn_head": jnp.zeros((1,), jnp.float32),
        "w_llm_head": jax.random.normal(ks[3], (1, D), jnp.float32) * 0.1,     # torch (out,in)
        "b_llm_head": jnp.zeros((1,), jnp.float32),
        "w_fusion":   jax.random.normal(ks[4], (1, 3), jnp.float32) * 0.1,     # Linear(3,1).weight
        "b_fusion":   jnp.zeros((1,), jnp.float32),
    }


def _pad_row(v):
    v = v.reshape(1, -1).astype(jnp.float32)
    return jnp.pad(v, ((0, 0), (0, 128 - v.shape[1])))


def fusion_model_forward(params, input_ids, attention_mask, cnn_inputs_nchw, distance):
    # ---- plain-JAX glue: layout conversion, im2col, embedding gather, param packing ----
    x_nhwc = jnp.transpose(cnn_inputs_nchw, (0, 2, 3, 1)).astype(jnp.float32)
    patches = im2col(x_nhwc)                                  # (B*HW, K)
    wconv_mat = params["w_conv"].reshape(K, COUT)             # matches im2col (kh, kw, c) order
    emb = params["emb_table"][input_ids]                      # (B, S, D) gather (glue)
    mask3 = attention_mask.astype(jnp.float32)[:, :, None]    # (B, S, 1)
    dist = distance.astype(jnp.float32)                       # (B, 1)

    # pack all tiny parameter vectors into one VMEM tile (single prologue DMA)
    pvec = jnp.concatenate([_pad_row(params["b_conv"]),
                            _pad_row(params["w_cnn_head"]),
                            _pad_row(params["w_llm_head"])], axis=0)   # (3, 128)
    # pack all 1-element params into one SMEM scalar vector
    scal = jnp.concatenate([params["b_cnn_head"].reshape(1),
                            params["b_llm_head"].reshape(1),
                            params["w_fusion"].reshape(3),
                            params["b_fusion"].reshape(1),
                            jnp.zeros((2,), jnp.float32)]).astype(jnp.float32)  # (8,)

    vmem = pl.BlockSpec(memory_space=pltpu.MemorySpace.VMEM)
    smem = pl.BlockSpec(memory_space=pltpu.MemorySpace.SMEM)

    logits = pl.pallas_call(
        fusion_kernel,
        out_shape=jax.ShapeDtypeStruct((B, 1), jnp.float32),
        in_specs=[vmem,   # patches (B*HW, K)
                  vmem,   # wconv   (K, COUT)
                  vmem,   # emb     (B, S, D)
                  vmem,   # mask    (B, S, 1)
                  vmem,   # dist    (B, 1)
                  vmem,   # packed param rows (3, 128)
                  smem],  # packed scalars (8,)
        out_specs=vmem,
    )(patches, wconv_mat, emb, mask3, dist, pvec, scal)
    return logits


def reference_forward(params, input_ids, attention_mask, cnn_inputs_nchw, distance):
    """Pure-JAX reference for correctness checking."""
    x_nhwc = jnp.transpose(cnn_inputs_nchw, (0, 2, 3, 1)).astype(jnp.float32)
    patches = im2col(x_nhwc).reshape(B, HW, K)
    y = jnp.maximum(patches @ params["w_conv"].reshape(K, COUT) + params["b_conv"], 0.0)
    cnn_feat = jnp.mean(y, axis=1)                                     # (B, COUT)
    cnn_logits = cnn_feat @ params["w_cnn_head"].T + params["b_cnn_head"]
    emb = params["emb_table"][input_ids]
    m = attention_mask.astype(jnp.float32)[:, :, None]
    pooled = jnp.sum(emb * m, axis=1) / jnp.maximum(jnp.sum(m, axis=1), 1.0)
    llm_logits = pooled @ params["w_llm_head"].T + params["b_llm_head"]
    stack = jnp.concatenate([distance.astype(jnp.float32), cnn_logits, llm_logits], axis=1)
    return stack @ params["w_fusion"].T + params["b_fusion"]


if __name__ == "__main__":
    key = jax.random.PRNGKey(0)
    k_ids, k_img, k_dist, k_params = jax.random.split(key, 4)

    input_ids = jax.random.randint(k_ids, (B, S), 0, V, dtype=jnp.int32)
    attention_mask = jnp.concatenate(
        [jnp.ones((B, S - 2), jnp.float32), jnp.zeros((B, 2), jnp.float32)], axis=1)
    cnn_inputs = jax.random.normal(k_img, (B, C, H, W), jnp.float32)   # NCHW like PyTorch
    distance = jax.random.normal(k_dist, (B, 1), jnp.float32)

    params = init_params(k_params)

    logits = fusion_model_forward(params, input_ids, attention_mask, cnn_inputs, distance)
    logits = jax.block_until_ready(logits)

    ref = reference_forward(params, input_ids, attention_mask, cnn_inputs, distance)
    assert logits.shape == (B, 1)
    np.testing.assert_allclose(np.asarray(logits), np.asarray(ref), rtol=1e-4, atol=1e-4)
    print("KERNEL_OK")
</pallas_src>

<mosaic_0001>
module attributes {stable_mosaic.version = 11 : i64} {
  func.func @fusion_kernel(%arg0: memref<512x36xf32, #tpu.memory_space<vmem>>, %arg1: memref<36x8xf32, #tpu.memory_space<vmem>>, %arg2: memref<2x8x32xf32, #tpu.memory_space<vmem>>, %arg3: memref<2x8x1xf32, #tpu.memory_space<vmem>>, %arg4: memref<2x1xf32, #tpu.memory_space<vmem>>, %arg5: memref<3x128xf32, #tpu.memory_space<vmem>>, %arg6: memref<8xf32, #tpu.memory_space<smem>>, %arg7: memref<2x1xf32, #tpu.memory_space<vmem>>) attributes {dimension_semantics = [], scalar_prefetch = 0 : i64, scratch_operands = 0 : i64, tpu.core_type = #tpu.core_type<tc>} {
    %c0 = arith.constant 0 : index
    %c0_0 = arith.constant 0 : index
    %0 = vector.load %arg5[%c0, %c0_0] : memref<3x128xf32, #tpu.memory_space<vmem>>, vector<1x8xf32>
    %c1 = arith.constant 1 : index
    %c0_1 = arith.constant 0 : index
    %1 = vector.load %arg5[%c1, %c0_1] : memref<3x128xf32, #tpu.memory_space<vmem>>, vector<1x8xf32>
    %c2 = arith.constant 2 : index
    %c0_2 = arith.constant 0 : index
    %2 = vector.load %arg5[%c2, %c0_2] : memref<3x128xf32, #tpu.memory_space<vmem>>, vector<1x32xf32>
    %c0_3 = arith.constant 0 : index
    %c0_4 = arith.constant 0 : index
    %3 = vector.load %arg0[%c0_3, %c0_4] : memref<512x36xf32, #tpu.memory_space<vmem>>, vector<512x36xf32>
    %c0_5 = arith.constant 0 : index
    %c0_6 = arith.constant 0 : index
    %4 = vector.load %arg1[%c0_5, %c0_6] : memref<36x8xf32, #tpu.memory_space<vmem>>, vector<36x8xf32>
    %cst = arith.constant dense<0.000000e+00> : vector<512x8xf32>
    %5 = tpu.matmul %3, %4, %cst {dimension_numbers = #tpu.dot_dimension_numbers<[1], [0], [0], [1], [0, 0, 1, 1], [], []>} : vector<512x36xf32>, vector<36x8xf32>, vector<512x8xf32> -> vector<512x8xf32>
    %6 = vector.broadcast %0 : vector<1x8xf32> to vector<512x8xf32>
    %7 = arith.addf %5, %6 : vector<512x8xf32>
    %cst_7 = arith.constant 0.000000e+00 : f32
    %8 = vector.broadcast %cst_7 : f32 to vector<512x8xf32>
    %9 = arith.maximumf %7, %8 : vector<512x8xf32>
    %10 = vector.shape_cast %9 : vector<512x8xf32> to vector<2x256x8xf32>
    %cst_8 = arith.constant dense<0.000000e+00> : vector<2x8xf32>
    %11 = vector.multi_reduction <add>, %10, %cst_8 [1] : vector<2x256x8xf32> to vector<2x8xf32>
    %cst_9 = arith.constant 2.560000e+02 : f32
    %12 = vector.broadcast %cst_9 : f32 to vector<2x8xf32>
    %13 = arith.divf %11, %12 : vector<2x8xf32>
    %14 = vector.broadcast %1 : vector<1x8xf32> to vector<2x8xf32>
    %15 = arith.mulf %13, %14 : vector<2x8xf32>
    %cst_10 = arith.constant dense<0.000000e+00> : vector<2xf32>
    %16 = vector.multi_reduction <add>, %15, %cst_10 [1] : vector<2x8xf32> to vector<2xf32>
    %17 = vector.shape_cast %16 : vector<2xf32> to vector<2x1xf32>
    %c0_11 = arith.constant 0 : index
    %18 = memref.load %arg6[%c0_11] : memref<8xf32, #tpu.memory_space<smem>>
    %19 = vector.broadcast %18 : f32 to vector<2x1xf32>
    %20 = arith.addf %17, %19 : vector<2x1xf32>
    %c0_12 = arith.constant 0 : index
    %c0_13 = arith.constant 0 : index
    %c0_14 = arith.constant 0 : index
    %21 = vector.load %arg2[%c0_12, %c0_13, %c0_14] : memref<2x8x32xf32, #tpu.memory_space<vmem>>, vector<2x8x32xf32>
    %c0_15 = arith.constant 0 : index
    %c0_16 = arith.constant 0 : index
    %c0_17 = arith.constant 0 : index
    %22 = vector.load %arg3[%c0_15, %c0_16, %c0_17] : memref<2x8x1xf32, #tpu.memory_space<vmem>>, vector<2x8x1xf32>
    %cst_18 = arith.constant dense<0.000000e+00> : vector<2x1xf32>
    %23 = vector.multi_reduction <add>, %22, %cst_18 [1] : vector<2x8x1xf32> to vector<2x1xf32>
    %cst_19 = arith.constant 1.000000e+00 : f32
    %24 = vector.broadcast %cst_19 : f32 to vector<2x1xf32>
    %25 = arith.maximumf %23, %24 : vector<2x1xf32>
    %26 = vector.broadcast %22 : vector<2x8x1xf32> to vector<2x8x32xf32>
    %27 = arith.mulf %21, %26 : vector<2x8x32xf32>
    %cst_20 = arith.constant dense<0.000000e+00> : vector<2x32xf32>
    %28 = vector.multi_reduction <add>, %27, %cst_20 [1] : vector<2x8x32xf32> to vector<2x32xf32>
    %29 = vector.broadcast %25 : vector<2x1xf32> to vector<2x32xf32>
    %30 = arith.divf %28, %29 : vector<2x32xf32>
    %31 = vector.broadcast %2 : vector<1x32xf32> to vector<2x32xf32>
    %32 = arith.mulf %30, %31 : vector<2x32xf32>
    %cst_21 = arith.constant dense<0.000000e+00> : vector<2xf32>
    %33 = vector.multi_reduction <add>, %32, %cst_21 [1] : vector<2x32xf32> to vector<2xf32>
    %34 = vector.shape_cast %33 : vector<2xf32> to vector<2x1xf32>
    %c1_22 = arith.constant 1 : index
    %35 = memref.load %arg6[%c1_22] : memref<8xf32, #tpu.memory_space<smem>>
    %36 = vector.broadcast %35 : f32 to vector<2x1xf32>
    %37 = arith.addf %34, %36 : vector<2x1xf32>
    %c0_23 = arith.constant 0 : index
    %c0_24 = arith.constant 0 : index
    %38 = vector.load %arg4[%c0_23, %c0_24] : memref<2x1xf32, #tpu.memory_space<vmem>>, vector<2x1xf32>
    %c2_25 = arith.constant 2 : index
    %39 = memref.load %arg6[%c2_25] : memref<8xf32, #tpu.memory_space<smem>>
    %40 = vector.broadcast %39 : f32 to vector<2x1xf32>
    %41 = arith.mulf %38, %40 : vector<2x1xf32>
    %c3 = arith.constant 3 : index
    %42 = memref.load %arg6[%c3] : memref<8xf32, #tpu.memory_space<smem>>
    %43 = vector.broadcast %42 : f32 to vector<2x1xf32>
    %44 = arith.mulf %20, %43 : vector<2x1xf32>
    %45 = arith.addf %41, %44 : vector<2x1xf32>
    %c4 = arith.constant 4 : index
    %46 = memref.load %arg6[%c4] : memref<8xf32, #tpu.memory_space<smem>>
    %47 = vector.broadcast %46 : f32 to vector<2x1xf32>
    %48 = arith.mulf %37, %47 : vector<2x1xf32>
    %49 = arith.addf %45, %48 : vector<2x1xf32>
    %c5 = arith.constant 5 : index
    %50 = memref.load %arg6[%c5] : memref<8xf32, #tpu.memory_space<smem>>
    %51 = vector.broadcast %50 : f32 to vector<2x1xf32>
    %52 = arith.addf %49, %51 : vector<2x1xf32>
    %c0_26 = arith.constant 0 : index
    %c0_27 = arith.constant 0 : index
    %53 = vector.load %arg7[%c0_26, %c0_27] : memref<2x1xf32, #tpu.memory_space<vmem>>, vector<2x1xf32>
    tpu.vector_store %arg7[%c0_26, %c0_27], %52 {strides = array<i32>} : memref<2x1xf32, #tpu.memory_space<vmem>>, vector<2x1xf32>,
    return
  }
}

</mosaic_0001>

<bundles_post_ra>
// kernel: tpu_custom_call.1
= control target key start
LH: loop header
LB: loop body
LE: loop exit
PB: predicated region body
PF: predicated region fallthrough
CT: control target
= control target key end

     0   :  { %12 = vsyncpa [#allocation3], 0  ;;  %s1783_s0 = inlined_call_operand.vmem [shape: f32[512,36], index: 0, kind: input, shape index: {}]   ;;  %s1784_s1 = inlined_call_operand.vmem [shape: f32[36,8], index: 1, kind: input, shape index: {}]   ;;  %s1785_s2 = inlined_call_operand.vmem [shape: f32[2,8,32], index: 2, kind: input, shape index: {}]   ;;  %s1786_s3 = inlined_call_operand.vmem [shape: f32[2,8,1], index: 3, kind: input, shape index: {}]   ;;  %s1787_s4 = inlined_call_operand.vmem [shape: f32[2,1], index: 4, kind: input, shape index: {}]   ;;  %s1788_s5 = inlined_call_operand.vmem [shape: f32[3,128], index: 5, kind: input, shape index: {}]   ;;  %s1789_s6 = inlined_call_operand.vmem [shape: f32[8], index: 6, kind: input, shape index: {}]   ;;  %s1790_s7 = inlined_call_operand.vmem [shape: f32[2,1], index: 7, kind: output, shape index: {}]  }
   0x1   :  { %s31_s26 = sshll.u32 %s1789_s6, 4  ;;  %s32_s26 = int_to_ptr.vmem [resolvable:$true] %s31_s26 }
   0x2   :  { %s1294_s27 = scalar_lea.vmem %s32_s26, 16  ;;  %p1299_p1 = scmp.lt.s32.totalorder %s32_s26, %s32_s26 }
   0x3   :  { %p1295_p0 = scmp.ne.s32.totalorder %s32_s26, %s1294_s27  ;;  %p1300_p2 = scmp.lt.s32.totalorder %s1294_s27, %s1294_s27 }
   0x5   :  { %p1301_p3 = por %p1300_p2, %p1299_p1 }
   0x7   :  { %p1302_p4 = pnand %p1301_p3, %p1295_p0 }
   0x9   :  { %1305 = shalt.err (!%p1302_p4)
}
   0xa   :  { %s1308_s28 = smov [#allocation2]  }
   0xb   :  { %34 = dma.vmem_to_smem %s32_s26, 16, %s1308_s28, [#allocation3]  }
   0xc   :  { %1306 = dma.done.wait [#allocation3], 16  }
   0xd   :  { %1307 = vsyncadd [#allocation3], 4294967280 }
   0xe   :  { %38 = sfence }
   0xf   :  { %v106_v0 = vld [vmem:[%s1784_s1] sm:$0xff]  ;;  %v107_v1 = vld [vmem:[%s1784_s1 + $0x8] sm:$0xff]  ;;  %v108_v2 = vld [vmem:[%s1784_s1 + $0x10] sm:$0xff]  ;;  %vm115_vm0 = vcmask 293888   ;;  %v1309_v6 = vmov 0   ;;  %vm308_vm1 = vcmask 1043456  }
  0x10   :  { %v1272_v3 = vpack.c.bf16 %v107_v1, %v106_v0  ;;  %v109_v4 = vld [vmem:[%s1784_s1 + $0x18] sm:$0xff]  ;;  %v42_v5 = vld [vmem:[%s1783_s0] sm:$0xff]  ;;  %1288 = vset.pattern.permute.xlu0 %v1309_v6  ;;  %1289 = vset.pattern.permute.xlu1 %v1309_v6  ;;  %v43_v10 = vld [vmem:[%s1783_s0 + $0x8] sm:$0xff]  ;;  %vm926_vm2 = vcmask 7168   ;;  %vm955_vm3 = vcmask 261120   ;;  %vm912_vm4 = vcmask 1041409  }
  0x11   :  { %v1276_v7 = vpack.c.bf16 %v109_v4, %v108_v2  ;;  %1176 = vmatprep.mubr.msk.f32.mxu0 %vm115_vm0, %v42_v5  ;;  %v74_v8 = vld [vmem:[%s1783_s0 + $0x100] sm:$0xff]  ;;  %v75_v11 = vld [vmem:[%s1783_s0 + $0x108] sm:$0xff]  ;;  %v44_v12 = vld [vmem:[%s1783_s0 + $0x10] sm:$0xff]  ;;  %vm995_vm5 = vcmask 254976   ;;  %vm761_vm6 = vcmask 64512   ;;  %vm915_vm7 = vcmask 58368  }
  0x12   :  { %1273 = vmatprep.subr.bf16.mxu0 %v1272_v3  ;;  %1280 = vmatprep.subr.bf16.mxu1 %v1272_v3  ;;  %v110_v9 = vld [vmem:[%s1784_s1 + $0x20] sm:$0xf]  ;;  %v76_v13 = vld [vmem:[%s1783_s0 + $0x110] sm:$0xff]  ;;  %v45_v14 = vld [vmem:[%s1783_s0 + $0x18] sm:$0xff]  ;;  %s1092_s25 = sld [smem:[#allocation2 + $0x1]]  ;;  %s919_s26 = sld [smem:[#allocation2]] }
  0x13   :  { %1275 = vmatpush3.bf16.msra.mxu0 %v1272_v3  ;;  %1283 = vmatpush3.bf16.msra.mxu1 %v1272_v3  ;;  %v77_v15 = vld [vmem:[%s1783_s0 + $0x118] sm:$0xff]  ;;  %v46_v16 = vld [vmem:[%s1783_s0 + $0x20] sm:$0xff]  ;;  %v47_v18 = vld [vmem:[%s1783_s0 + $0x28] sm:$0xff]  ;;  %s1093_s27 = sld [smem:[#allocation2 + $0x2]]  ;;  %s1094_s28 = sld [smem:[#allocation2 + $0x3]]  ;;  %vm1017_vm8 = vcmask 1024  }
  0x14   :  { %1277 = vmatprep.subr.bf16.mxu0 %v1276_v7  ;;  %1281 = vmatprep.subr.bf16.mxu1 %v1276_v7  ;;  %v78_v17 = vld [vmem:[%s1783_s0 + $0x120] sm:$0xff]  ;;  %v79_v19 = vld [vmem:[%s1783_s0 + $0x128] sm:$0xff]  ;;  %v48_v20 = vld [vmem:[%s1783_s0 + $0x30] sm:$0xff]  ;;  %s1095_s29 = sld [smem:[#allocation2 + $0x4]]  ;;  %s1096_s8 = sld [smem:[#allocation2 + $0x5]] }
  0x15   :  { %1224 = vmatprep.mubr.msk.f32.mxu1 %vm115_vm0, %v74_v8  ;;  %v80_v21 = vld [vmem:[%s1783_s0 + $0x130] sm:$0xff]  ;;  %v49_v22 = vld [vmem:[%s1783_s0 + $0x38] sm:$0xff]  ;;  %v50_v24 = vld [vmem:[%s1783_s0 + $0x40] sm:$0xff] }
  0x16   :  { %v81_v23 = vld [vmem:[%s1783_s0 + $0x138] sm:$0xff]  ;;  %v82_v25 = vld [vmem:[%s1783_s0 + $0x140] sm:$0xff]  ;;  %v925_v26 = vld [vmem:[%s1786_s3 + $0x8] sm:$0xff] }
  0x17   :  { %1279 = vmatpush3.bf16.msra.mxu0 %v1276_v7  ;;  %1284 = vmatpush3.bf16.msra.mxu1 %v1276_v7  ;;  %v924_v27 = vld [vmem:[%s1786_s3] sm:$0xff]  ;;  %v934_v28 = vsel %vm926_vm2, %v925_v26, 0.0  ;;  %v51_v32 = vld [vmem:[%s1783_s0 + $0x48] sm:$0xff]  ;;  %v52_v34 = vld [vmem:[%s1783_s0 + $0x50] sm:$0xff] }
  0x18   :  { %1174 = vmatprep.subr.msk.mxu0 %vm308_vm1, %v110_v9  ;;  %1282 = vmatprep.subr.msk.mxu1 %vm308_vm1, %v110_v9  ;;  %v927_v29 = vsel %vm926_vm2, %v924_v27, 0.0  ;;  %v935_v30 = vrot.slane %v934_v28, 4  ;;  %v83_v33 = vld [vmem:[%s1783_s0 + $0x148] sm:$0xff]  ;;  %v84_v35 = vld [vmem:[%s1783_s0 + $0x150] sm:$0xff]  ;;  %v53_v40 = vld [vmem:[%s1783_s0 + $0x58] sm:$0xff] }
  0x19   :  { %950 = vperm.xlu0 %1288, %v925_v26   ;;  %v928_v31 = vrot.slane %v927_v29, 4  ;;  %v85_v41 = vld [vmem:[%s1783_s0 + $0x158] sm:$0xff]  ;;  %v54_v42 = vld [vmem:[%s1783_s0 + $0x60] sm:$0xff]  ;;  %v55_v48 = vld [vmem:[%s1783_s0 + $0x68] sm:$0xff] }
  0x1a   :  { %v936_v36 = vadd.f32 %v935_v30, %v934_v28  ;;  %v86_v43 = vld [vmem:[%s1783_s0 + $0x160] sm:$0xff]  ;;  %v87_v49 = vld [vmem:[%s1783_s0 + $0x168] sm:$0xff]  ;;  %v56_v50 = vld [vmem:[%s1783_s0 + $0x70] sm:$0xff] }
  0x1b   :  { %1175 = vmatpush3.msk.msra.mxu0 %vm308_vm1, %v110_v9  ;;  %1285 = vmatpush3.msk.msra.mxu1 %vm308_vm1, %v110_v9  ;;  %v929_v37 = vadd.f32 %v928_v31, %v927_v29  ;;  %v88_v51 = vld [vmem:[%s1783_s0 + $0x170] sm:$0xff]  ;;  %v57_v55 = vld [vmem:[%s1783_s0 + $0x78] sm:$0xff]  ;;  %v58_v57 = vld [vmem:[%s1783_s0 + $0x80] sm:$0xff] }
  0x1c   :  { %1177 = vmatmul.mubr.msk.f32.vlgmr.msra.gmra.mrb[0].mxu0 %vm115_vm0, %v43_v10  ;;  %1225 = vmatmul.mubr.msk.f32.vlgmr.msra.gmra.mrb[0].mxu1 %vm115_vm0, %v75_v11  ;;  %v937_v38 = vrot.slane %v936_v36, 2  ;;  %v89_v56 = vld [vmem:[%s1783_s0 + $0x178] sm:$0xff]  ;;  %v90_v58 = vld [vmem:[%s1783_s0 + $0x180] sm:$0xff]  ;;  %v59_v60 = vld [vmem:[%s1783_s0 + $0x88] sm:$0xff] }
  0x1d   :  { %1179 = vmatprep.mubr.msk.f32.mxu0 %vm115_vm0, %v44_v12  ;;  %1227 = vmatprep.mubr.msk.f32.mxu1 %vm115_vm0, %v76_v13  ;;  %v930_v39 = vrot.slane %v929_v37, 2  ;;  %v91_v61 = vld [vmem:[%s1783_s0 + $0x188] sm:$0xff]  ;;  %v60_v62 = vld [vmem:[%s1783_s0 + $0x90] sm:$0xff]  ;;  %v61_v0 = vld [vmem:[%s1783_s0 + $0x98] sm:$0xff] }
  0x1e   :  { %945 = vperm.xlu0 %1288, %v924_v27   ;;  %v938_v44 = vadd.f32 %v937_v38, %v936_v36  ;;  %v92_v63 = vld [vmem:[%s1783_s0 + $0x190] sm:$0xff]  ;;  %v93_v1 = vld [vmem:[%s1783_s0 + $0x198] sm:$0xff]  ;;  %v62_v2 = vld [vmem:[%s1783_s0 + $0xa0] sm:$0xff] }
  0x1f   :  { %v931_v45 = vadd.f32 %v930_v39, %v929_v37  ;;  %v94_v3 = vld [vmem:[%s1783_s0 + $0x1a0] sm:$0xff]  ;;  %v63_v4 = vld [vmem:[%s1783_s0 + $0xa8] sm:$0xff]  ;;  %v64_v6 = vld [vmem:[%s1783_s0 + $0xb0] sm:$0xff] }
  0x20   :  { %1180 = vmatmul.mubr.msk.f32.gmra.mrb[2].mxu0 %vm115_vm0, %v45_v14  ;;  %1228 = vmatmul.mubr.msk.f32.gmra.mrb[2].mxu1 %vm115_vm0, %v77_v15  ;;  %v939_v46 = vrot.slane %v938_v44, 1  ;;  %v95_v5 = vld [vmem:[%s1783_s0 + $0x1a8] sm:$0xff]  ;;  %v96_v7 = vld [vmem:[%s1783_s0 + $0x1b0] sm:$0xff]  ;;  %v65_v8 = vld [vmem:[%s1783_s0 + $0xb8] sm:$0xff] }
  0x21   :  { %1182 = vmatprep.mubr.msk.f32.mxu0 %vm115_vm0, %v46_v16  ;;  %1230 = vmatprep.mubr.msk.f32.mxu1 %vm115_vm0, %v78_v17  ;;  %v932_v47 = vrot.slane %v931_v45, 1  ;;  %v97_v9 = vld [vmem:[%s1783_s0 + $0x1b8] sm:$0xff]  ;;  %v66_v10 = vld [vmem:[%s1783_s0 + $0xc0] sm:$0xff]  ;;  %v67_v12 = vld [vmem:[%s1783_s0 + $0xc8] sm:$0xff] }
  0x22   :  { %v940_v52 = vadd.f32 %v939_v46, %v938_v44  ;;  %v98_v11 = vld [vmem:[%s1783_s0 + $0x1c0] sm:$0xff]  ;;  %v99_v13 = vld [vmem:[%s1783_s0 + $0x1c8] sm:$0xff]  ;;  %v68_v14 = vld [vmem:[%s1783_s0 + $0xd0] sm:$0xff] }
  0x23   :  { %v933_v53 = vadd.f32 %v932_v47, %v931_v45  ;;  %v100_v15 = vld [vmem:[%s1783_s0 + $0x1d0] sm:$0xff]  ;;  %v69_v16 = vld [vmem:[%s1783_s0 + $0xd8] sm:$0xff]  ;;  %v923_v27 = vld [vmem:[%s1785_s2 + $0x8] sm:$0xff] }
  0x24   :  { %1183 = vmatmul.mubr.msk.f32.gmra.mrb[4].mxu0 %vm115_vm0, %v47_v18  ;;  %1231 = vmatmul.mubr.msk.f32.gmra.mrb[4].mxu1 %vm115_vm0, %v79_v19  ;;  %v942_v54 = vmax.f32 %v940_v52, 1.0  ;;  %v101_v17 = vld [vmem:[%s1783_s0 + $0x1d8] sm:$0xff]  ;;  %v70_v18 = vld [vmem:[%s1783_s0 + $0xe0] sm:$0xff] }
  0x25   :  { %1185 = vmatprep.mubr.msk.f32.mxu0 %vm115_vm0, %v48_v20  ;;  %1233 = vmatprep.mubr.msk.f32.mxu1 %vm115_vm0, %v80_v21  ;;  %v941_v59 = vmax.f32 %v933_v53, 1.0  ;;  %v102_v19 = vld [vmem:[%s1783_s0 + $0x1e0] sm:$0xff]  ;;  %v71_v20 = vld [vmem:[%s1783_s0 + $0xe8] sm:$0xff] }
  0x26   :  { %977 = vperm.xlu1 %1289, %v942_v54   ;;  %v103_v21 = vld [vmem:[%s1783_s0 + $0x1e8] sm:$0xff]  ;;  %v922_v30 = vld [vmem:[%s1785_s2] sm:$0xff] }
  0x28   :  { %1186 = vmatmul.mubr.msk.f32.gmra.mrb[6].mxu0 %vm115_vm0, %v49_v22  ;;  %1234 = vmatmul.mubr.msk.f32.gmra.mrb[6].mxu1 %vm115_vm0, %v81_v23  ;;  %v72_v22 = vld [vmem:[%s1783_s0 + $0xf0] sm:$0xff] }
  0x29   :  { %1188 = vmatprep.mubr.msk.f32.mxu0 %vm115_vm0, %v50_v24  ;;  %1236 = vmatprep.mubr.msk.f32.mxu1 %vm115_vm0, %v82_v25  ;;  %v104_v23 = vld [vmem:[%s1783_s0 + $0x1f0] sm:$0xff]  ;;  %v73_v24 = vld [vmem:[%s1783_s0 + $0xf8] sm:$0xff] }
  0x2a   :  { %972 = vperm.xlu1 %1289, %v941_v59   ;;  %v105_v25 = vld [vmem:[%s1783_s0 + $0x1f8] sm:$0xff] }
  0x2c   :  { %1189 = vmatmul.mubr.msk.f32.gmra.mrb[8].mxu0 %vm115_vm0, %v51_v32  ;;  %1237 = vmatmul.mubr.msk.f32.gmra.mrb[8].mxu1 %vm115_vm0, %v83_v33 }
  0x2d   :  { %1191 = vmatprep.mubr.msk.f32.mxu0 %vm115_vm0, %v52_v34  ;;  %1239 = vmatprep.mubr.msk.f32.mxu1 %vm115_vm0, %v84_v35 }
  0x30   :  { %1192 = vmatmul.mubr.msk.f32.gmra.mrb[10].mxu0 %vm115_vm0, %v53_v40  ;;  %1240 = vmatmul.mubr.msk.f32.gmra.mrb[10].mxu1 %vm115_vm0, %v85_v41 }
  0x31   :  { %1194 = vmatprep.mubr.msk.f32.mxu0 %vm115_vm0, %v54_v42  ;;  %1242 = vmatprep.mubr.msk.f32.mxu1 %vm115_vm0, %v86_v43 }
  0x34   :  { %1195 = vmatmul.mubr.msk.f32.gmra.mrb[12].mxu0 %vm115_vm0, %v55_v48  ;;  %1243 = vmatmul.mubr.msk.f32.gmra.mrb[12].mxu1 %vm115_vm0, %v87_v49  ;;  %v1091_v48 = vld [vmem:[%s1788_s5 + $0x2] ss:$0 sm:$0xff] }
  0x35   :  { %1197 = vmatprep.mubr.msk.f32.mxu0 %vm115_vm0, %v56_v50  ;;  %1245 = vmatprep.mubr.msk.f32.mxu1 %vm115_vm0, %v88_v51 }
  0x38   :  { %1198 = vmatmul.mubr.msk.f32.gmra.mrb[14].mxu0 %vm115_vm0, %v57_v55  ;;  %1246 = vmatmul.mubr.msk.f32.gmra.mrb[14].mxu1 %vm115_vm0, %v89_v56 }
  0x39   :  { %1200 = vmatprep.mubr.msk.f32.mxu0 %vm115_vm0, %v58_v57  ;;  %1248 = vmatprep.mubr.msk.f32.mxu1 %vm115_vm0, %v90_v58  ;;  %v1643_v58 = vld [vmem:[%s1788_s5] ss:$0 sm:$0xff] }
  0x3c   :  { %1201 = vmatmul.mubr.msk.f32.gmra.mrb[16].mxu0 %vm115_vm0, %v59_v60  ;;  %1249 = vmatmul.mubr.msk.f32.gmra.mrb[16].mxu1 %vm115_vm0, %v91_v61 }
  0x3d   :  { %1203 = vmatprep.mubr.msk.f32.mxu0 %vm115_vm0, %v60_v62  ;;  %1251 = vmatprep.mubr.msk.f32.mxu1 %vm115_vm0, %v92_v63 }
  0x40   :  { %1204 = vmatmul.mubr.msk.f32.gmra.mrb[18].mxu0 %vm115_vm0, %v61_v0  ;;  %1252 = vmatmul.mubr.msk.f32.gmra.mrb[18].mxu1 %vm115_vm0, %v93_v1 }
  0x41   :  { %1206 = vmatprep.mubr.msk.f32.mxu0 %vm115_vm0, %v62_v2  ;;  %1254 = vmatprep.mubr.msk.f32.mxu1 %vm115_vm0, %v94_v3 }
  0x44   :  { %1207 = vmatmul.mubr.msk.f32.gmra.mrb[20].mxu0 %vm115_vm0, %v63_v4  ;;  %1255 = vmatmul.mubr.msk.f32.gmra.mrb[20].mxu1 %vm115_vm0, %v95_v5 }
  0x45   :  { %1209 = vmatprep.mubr.msk.f32.mxu0 %vm115_vm0, %v64_v6  ;;  %1257 = vmatprep.mubr.msk.f32.mxu1 %vm115_vm0, %v96_v7 }
  0x48   :  { %1210 = vmatmul.mubr.msk.f32.gmra.mrb[22].mxu0 %vm115_vm0, %v65_v8  ;;  %1258 = vmatmul.mubr.msk.f32.gmra.mrb[22].mxu1 %vm115_vm0, %v97_v9 }
  0x49   :  { %1212 = vmatprep.mubr.msk.f32.mxu0 %vm115_vm0, %v66_v10  ;;  %1260 = vmatprep.mubr.msk.f32.mxu1 %vm115_vm0, %v98_v11 }
  0x4c   :  { %1213 = vmatmul.mubr.msk.f32.gmra.mrb[24].mxu0 %vm115_vm0, %v67_v12  ;;  %1261 = vmatmul.mubr.msk.f32.gmra.mrb[24].mxu1 %vm115_vm0, %v99_v13 }
  0x4d   :  { %1215 = vmatprep.mubr.msk.f32.mxu0 %vm115_vm0, %v68_v14  ;;  %1263 = vmatprep.mubr.msk.f32.mxu1 %vm115_vm0, %v100_v15 }
  0x50   :  { %1216 = vmatmul.mubr.msk.f32.gmra.mrb[26].mxu0 %vm115_vm0, %v69_v16  ;;  %1264 = vmatmul.mubr.msk.f32.gmra.mrb[26].mxu1 %vm115_vm0, %v101_v17 }
  0x51   :  { %1218 = vmatprep.mubr.msk.f32.mxu0 %vm115_vm0, %v70_v18  ;;  %1266 = vmatprep.mubr.msk.f32.mxu1 %vm115_vm0, %v102_v19 }
  0x54   :  { %1219 = vmatmul.mubr.msk.f32.gmra.mrb[28].mxu0 %vm115_vm0, %v71_v20  ;;  %1267 = vmatmul.mubr.msk.f32.gmra.mrb[28].mxu1 %vm115_vm0, %v103_v21 }
  0x55   :  { %1221 = vmatprep.mubr.msk.f32.mxu0 %vm115_vm0, %v72_v22  ;;  %1269 = vmatprep.mubr.msk.f32.mxu1 %vm115_vm0, %v104_v23 }
  0x58   :  { %1222 = vmatmul.mubr.msk.f32.gmra.mrb[30].mxu0 %vm115_vm0, %v73_v24  ;;  %1270 = vmatmul.mubr.msk.f32.gmra.mrb[30].mxu1 %vm115_vm0, %v105_v25 }
  0x98   :  { %v951_v26 = vpop.permute.xlu0 %950 }
  0x99   :  { %v954_v28 = vmul.f32 %v951_v26, %v923_v27 }
  0x9b   :  { %v963_v31 = vsel %vm955_vm3, %v954_v28, 0.0 }
  0x9c   :  { %v964_v33 = vrot.slane %v963_v31, 4 }
  0x9d   :  { %v946_v29 = vpop.permute.xlu0 %945 }
  0x9e   :  { %v953_v32 = vmul.f32 %v946_v29, %v922_v30  ;;  %v965_v35 = vadd.f32 %v964_v33, %v963_v31 }
  0xa0   :  { %v956_v34 = vsel %vm955_vm3, %v953_v32, 0.0  ;;  %v966_v37 = vrot.slane %v965_v35, 2 }
  0xa1   :  { %v957_v36 = vrot.slane %v956_v34, 4 }
  0xa2   :  { %v967_v40 = vadd.f32 %v966_v37, %v965_v35 }
  0xa3   :  { %v958_v38 = vadd.f32 %v957_v36, %v956_v34 }
  0xa4   :  { %v968_v42 = vrot.slane %v967_v40, 1 }
  0xa5   :  { %v978_v39 = vpop.permute.xlu1 %977  ;;  %v959_v41 = vrot.slane %v958_v38, 2 }
  0xa6   :  { %1290 = vrcp.f32 %v978_v39  ;;  %v969_v45 = vadd.f32 %v968_v42, %v967_v40 }
  0xa7   :  { %v960_v43 = vadd.f32 %v959_v41, %v958_v38 }
  0xa9   :  { %v973_v44 = vpop.permute.xlu1 %972  ;;  %v961_v46 = vrot.slane %v960_v43, 1 }
  0xaa   :  { %1292 = vrcp.f32 %v973_v44 }
  0xab   :  { %v962_v49 = vadd.f32 %v961_v46, %v960_v43 }
  0xb0   :  { %v1291_v47 = vpop.eup %1290 }
  0xb1   :  { %v983_v50 = vmul.f32 %v1291_v47, %v969_v45 }
  0xb3   :  { %v989_v51 = vmul.f32 %v1091_v48, %v983_v50 }
  0xb4   :  { %v1293_v52 = vpop.eup %1292 }
  0xb5   :  { %v981_v53 = vmul.f32 %v1293_v52, %v962_v49  ;;  %v992_v54 = vrot.slane %v989_v51, 7 }
  0xb7   :  { %v988_v55 = vmul.f32 %v1091_v48, %v981_v53 }
  0xb9   :  { %v993_v56 = vsel %vm912_vm4, %v992_v54, %v988_v55 }
  0xba   :  { %v996_v57 = vsel %vm995_vm5, %v993_v56, 0.0 }
  0xbb   :  { %997 = vadd.xlane.f32.xlu1 %v996_v57 }
  0xef   :  { %v1226_v59 = vpop.f32.mrb[0].mxu1  ;;  %v1178_v60 = vpop.f32.mrb[0].mxu0 }
  0xf0   :  { %v544_v61 = vadd.f32 %v1226_v59, %v1643_v58  ;;  %v384_v62 = vadd.f32 %v1178_v60, %v1643_v58  ;;  %v538_v63 = vpop.f32.mrb[1].mxu1  ;;  %v378_v0 = vpop.f32.mrb[1].mxu0 }
  0xf1   :  { %v539_v1 = vadd.f32 %v1643_v58, %v538_v63  ;;  %v379_v2 = vadd.f32 %v1643_v58, %v378_v0 }
  0xf2   :  { %v730_v3 = vmax.f32 %v544_v61, 0.0  ;;  %v698_v4 = vmax.f32 %v384_v62, 0.0 }
  0xf3   :  { %v729_v5 = vmax.f32 %v539_v1, 0.0  ;;  %v697_v6 = vmax.f32 %v379_v2, 0.0  ;;  %v1181_v7 = vpop.f32.mrb[2].mxu0  ;;  %v1229_v8 = vpop.f32.mrb[2].mxu1 }
  0xf4   :  { %v832_v9 = vsel %vm761_vm6, %v730_v3, 0.0  ;;  %v763_v10 = vsel %vm761_vm6, %v698_v4, 0.0  ;;  %v394_v11 = vadd.f32 %v1181_v7, %v1643_v58  ;;  %v554_v12 = vadd.f32 %v1229_v8, %v1643_v58  ;;  %v388_v13 = vpop.f32.mrb[3].mxu0  ;;  %v548_v14 = vpop.f32.mrb[3].mxu1 }
  0xf5   :  { %v831_v15 = vsel %vm761_vm6, %v729_v5, 0.0  ;;  %v762_v16 = vsel %vm761_vm6, %v697_v6, 0.0  ;;  %v389_v17 = vadd.f32 %v1643_v58, %v388_v13  ;;  %v549_v18 = vadd.f32 %v1643_v58, %v548_v14 }
  0xf6   :  { %v833_v19 = vadd.f32 %v832_v9, %v831_v15  ;;  %v764_v20 = vadd.f32 %v763_v10, %v762_v16  ;;  %v700_v21 = vmax.f32 %v394_v11, 0.0  ;;  %v732_v22 = vmax.f32 %v554_v12, 0.0 }
  0xf7   :  { %v699_v23 = vmax.f32 %v389_v17, 0.0  ;;  %v731_v24 = vmax.f32 %v549_v18, 0.0  ;;  %v1184_v25 = vpop.f32.mrb[4].mxu0  ;;  %v1232_v26 = vpop.f32.mrb[4].mxu1 }
  0xf8   :  { %v767_v27 = vsel %vm761_vm6, %v700_v21, 0.0  ;;  %v404_v28 = vadd.f32 %v1184_v25, %v1643_v58  ;;  %v564_v29 = vadd.f32 %v1232_v26, %v1643_v58  ;;  %v398_v30 = vpop.f32.mrb[5].mxu0  ;;  %v558_v31 = vpop.f32.mrb[5].mxu1  ;;  %v836_v39 = vsel %vm761_vm6, %v732_v22, 0.0 }
  0xf9   :  { %v765_v32 = vsel %vm761_vm6, %v699_v23, 0.0  ;;  %v834_v33 = vsel %vm761_vm6, %v731_v24, 0.0  ;;  %v399_v34 = vadd.f32 %v1643_v58, %v398_v30  ;;  %v559_v35 = vadd.f32 %v1643_v58, %v558_v31 }
  0xfa   :  { %v766_v36 = vadd.f32 %v765_v32, %v764_v20  ;;  %v835_v37 = vadd.f32 %v834_v33, %v833_v19  ;;  %v702_v38 = vmax.f32 %v404_v28, 0.0  ;;  %v734_v40 = vmax.f32 %v564_v29, 0.0 }
  0xfb   :  { %v701_v41 = vmax.f32 %v399_v34, 0.0  ;;  %v733_v42 = vmax.f32 %v559_v35, 0.0  ;;  %v1187_v43 = vpop.f32.mrb[6].mxu0  ;;  %v1235_v44 = vpop.f32.mrb[6].mxu1 }
  0xfc   :  { %v771_v45 = vsel %vm761_vm6, %v702_v38, 0.0  ;;  %v768_v46 = vadd.f32 %v767_v27, %v766_v36  ;;  %v837_v47 = vadd.f32 %v836_v39, %v835_v37  ;;  %v408_v48 = vpop.f32.mrb[7].mxu0  ;;  %v568_v49 = vpop.f32.mrb[7].mxu1  ;;  %v414_v52 = vadd.f32 %v1187_v43, %v1643_v58 }
  0xfd   :  { %v769_v50 = vsel %vm761_vm6, %v701_v41, 0.0  ;;  %v838_v51 = vsel %vm761_vm6, %v733_v42, 0.0  ;;  %v574_v53 = vadd.f32 %v1235_v44, %v1643_v58  ;;  %v409_v56 = vadd.f32 %v1643_v58, %v408_v48 }
  0xfe   :  { %v770_v54 = vadd.f32 %v769_v50, %v768_v46  ;;  %v839_v55 = vadd.f32 %v838_v51, %v837_v47  ;;  %v569_v57 = vadd.f32 %v1643_v58, %v568_v49  ;;  %v840_v59 = vsel %vm761_vm6, %v734_v40, 0.0 }
  0xff   :  { %v704_v60 = vmax.f32 %v414_v52, 0.0  ;;  %v736_v61 = vmax.f32 %v574_v53, 0.0  ;;  %v1190_v62 = vpop.f32.mrb[8].mxu0  ;;  %v1238_v63 = vpop.f32.mrb[8].mxu1  ;;  %v703_v0 = vmax.f32 %v409_v56, 0.0 }
 0x100   :  { %v772_v1 = vadd.f32 %v771_v45, %v770_v54  ;;  %v735_v2 = vmax.f32 %v569_v57, 0.0  ;;  %v841_v3 = vadd.f32 %v840_v59, %v839_v55  ;;  %v418_v4 = vpop.f32.mrb[9].mxu0  ;;  %v578_v5 = vpop.f32.mrb[9].mxu1  ;;  %v424_v8 = vadd.f32 %v1190_v62, %v1643_v58 }
 0x101   :  { %v775_v6 = vsel %vm761_vm6, %v704_v60, 0.0  ;;  %v844_v7 = vsel %vm761_vm6, %v736_v61, 0.0  ;;  %v584_v9 = vadd.f32 %v1238_v63, %v1643_v58  ;;  %v773_v10 = vsel %vm761_vm6, %v703_v0, 0.0 }
 0x102   :  { %v842_v11 = vsel %vm761_vm6, %v735_v2, 0.0  ;;  %v419_v12 = vadd.f32 %v1643_v58, %v418_v4  ;;  %v579_v13 = vadd.f32 %v1643_v58, %v578_v5  ;;  %v774_v14 = vadd.f32 %v773_v10, %v772_v1 }
 0x103   :  { %v843_v15 = vadd.f32 %v842_v11, %v841_v3  ;;  %v706_v16 = vmax.f32 %v424_v8, 0.0  ;;  %v738_v17 = vmax.f32 %v584_v9, 0.0  ;;  %v1193_v18 = vpop.f32.mrb[10].mxu0  ;;  %v1241_v19 = vpop.f32.mrb[10].mxu1 }
 0x104   :  { %v705_v20 = vmax.f32 %v419_v12, 0.0  ;;  %v737_v21 = vmax.f32 %v579_v13, 0.0  ;;  %v434_v22 = vadd.f32 %v1193_v18, %v1643_v58  ;;  %v594_v23 = vadd.f32 %v1241_v19, %v1643_v58  ;;  %v428_v24 = vpop.f32.mrb[11].mxu0  ;;  %v588_v25 = vpop.f32.mrb[11].mxu1 }
 0x105   :  { %v776_v26 = vadd.f32 %v775_v6, %v774_v14  ;;  %v845_v27 = vadd.f32 %v844_v7, %v843_v15  ;;  %v779_v28 = vsel %vm761_vm6, %v706_v16, 0.0  ;;  %v429_v34 = vadd.f32 %v1643_v58, %v428_v24 }
 0x106   :  { %v777_v29 = vsel %vm761_vm6, %v705_v20, 0.0  ;;  %v846_v30 = vsel %vm761_vm6, %v737_v21, 0.0  ;;  %v708_v31 = vmax.f32 %v434_v22, 0.0  ;;  %v589_v35 = vadd.f32 %v1643_v58, %v588_v25 }
 0x107   :  { %v778_v32 = vadd.f32 %v777_v29, %v776_v26  ;;  %v847_v33 = vadd.f32 %v846_v30, %v845_v27  ;;  %v1196_v36 = vpop.f32.mrb[12].mxu0  ;;  %v1244_v37 = vpop.f32.mrb[12].mxu1  ;;  %v848_v38 = vsel %vm761_vm6, %v738_v17, 0.0  ;;  %v740_v39 = vmax.f32 %v594_v23, 0.0 }
 0x108   :  { %v444_v40 = vadd.f32 %v1196_v36, %v1643_v58  ;;  %v604_v41 = vadd.f32 %v1244_v37, %v1643_v58  ;;  %v438_v42 = vpop.f32.mrb[13].mxu0  ;;  %v598_v43 = vpop.f32.mrb[13].mxu1  ;;  %v707_v44 = vmax.f32 %v429_v34, 0.0  ;;  %v739_v46 = vmax.f32 %v589_v35, 0.0 }
 0x109   :  { %v780_v45 = vadd.f32 %v779_v28, %v778_v32  ;;  %v849_v47 = vadd.f32 %v848_v38, %v847_v33  ;;  %v439_v49 = vadd.f32 %v1643_v58, %v438_v42  ;;  %v599_v50 = vadd.f32 %v1643_v58, %v598_v43 }
 0x10a   :  { %v710_v48 = vmax.f32 %v444_v40, 0.0  ;;  %v783_v51 = vsel %vm761_vm6, %v708_v31, 0.0  ;;  %v781_v52 = vsel %vm761_vm6, %v707_v44, 0.0  ;;  %v850_v53 = vsel %vm761_vm6, %v739_v46, 0.0 }
 0x10b   :  { %v742_v54 = vmax.f32 %v604_v41, 0.0  ;;  %v1199_v55 = vpop.f32.mrb[14].mxu0  ;;  %v1247_v56 = vpop.f32.mrb[14].mxu1  ;;  %v852_v57 = vsel %vm761_vm6, %v740_v39, 0.0  ;;  %v782_v59 = vadd.f32 %v781_v52, %v780_v45  ;;  %v851_v60 = vadd.f32 %v850_v53, %v849_v47 }
 0x10c   :  { %v787_v61 = vsel %vm761_vm6, %v710_v48, 0.0  ;;  %v448_v62 = vpop.f32.mrb[15].mxu0  ;;  %v608_v63 = vpop.f32.mrb[15].mxu1  ;;  %v709_v0 = vmax.f32 %v439_v49, 0.0  ;;  %v741_v1 = vmax.f32 %v599_v50, 0.0  ;;  %v454_v2 = vadd.f32 %v1199_v55, %v1643_v58 }
 0x10d   :  { %v614_v3 = vadd.f32 %v1247_v56, %v1643_v58  ;;  %v784_v4 = vadd.f32 %v783_v51, %v782_v59  ;;  %v853_v5 = vadd.f32 %v852_v57, %v851_v60  ;;  %v449_v6 = vadd.f32 %v1643_v58, %v448_v62 }
 0x10e   :  { %v609_v7 = vadd.f32 %v1643_v58, %v608_v63  ;;  %v856_v8 = vsel %vm761_vm6, %v742_v54, 0.0  ;;  %v785_v9 = vsel %vm761_vm6, %v709_v0, 0.0  ;;  %v854_v10 = vsel %vm761_vm6, %v741_v1, 0.0 }
 0x10f   :  { %v712_v11 = vmax.f32 %v454_v2, 0.0  ;;  %v1202_v12 = vpop.f32.mrb[16].mxu0  ;;  %v1250_v13 = vpop.f32.mrb[16].mxu1  ;;  %v786_v14 = vadd.f32 %v785_v9, %v784_v4  ;;  %v855_v15 = vadd.f32 %v854_v10, %v853_v5  ;;  %v711_v16 = vmax.f32 %v449_v6, 0.0 }
 0x110   :  { %v743_v17 = vmax.f32 %v609_v7, 0.0  ;;  %v458_v18 = vpop.f32.mrb[17].mxu0  ;;  %v618_v19 = vpop.f32.mrb[17].mxu1  ;;  %v744_v21 = vmax.f32 %v614_v3, 0.0  ;;  %v464_v22 = vadd.f32 %v1202_v12, %v1643_v58  ;;  %v624_v23 = vadd.f32 %v1250_v13, %v1643_v58 }
 0x111   :  { %v791_v20 = vsel %vm761_vm6, %v712_v11, 0.0  ;;  %v788_v24 = vadd.f32 %v787_v61, %v786_v14  ;;  %v789_v25 = vsel %vm761_vm6, %v711_v16, 0.0  ;;  %v857_v26 = vadd.f32 %v856_v8, %v855_v15 }
 0x112   :  { %v858_v27 = vsel %vm761_vm6, %v743_v17, 0.0  ;;  %v714_v28 = vmax.f32 %v464_v22, 0.0  ;;  %v746_v29 = vmax.f32 %v624_v23, 0.0  ;;  %v459_v30 = vadd.f32 %v1643_v58, %v458_v18 }
 0x113   :  { %v619_v31 = vadd.f32 %v1643_v58, %v618_v19  ;;  %v1205_v32 = vpop.f32.mrb[18].mxu0  ;;  %v1253_v33 = vpop.f32.mrb[18].mxu1  ;;  %v790_v34 = vadd.f32 %v789_v25, %v788_v24  ;;  %v859_v35 = vadd.f32 %v858_v27, %v857_v26  ;;  %v860_v40 = vsel %vm761_vm6, %v744_v21, 0.0 }
 0x114   :  { %v474_v36 = vadd.f32 %v1205_v32, %v1643_v58  ;;  %v634_v37 = vadd.f32 %v1253_v33, %v1643_v58  ;;  %v468_v38 = vpop.f32.mrb[19].mxu0  ;;  %v628_v39 = vpop.f32.mrb[19].mxu1  ;;  %v795_v41 = vsel %vm761_vm6, %v714_v28, 0.0  ;;  %v713_v42 = vmax.f32 %v459_v30, 0.0 }
 0x115   :  { %v745_v43 = vmax.f32 %v619_v31, 0.0  ;;  %v792_v44 = vadd.f32 %v791_v20, %v790_v34  ;;  %v861_v45 = vadd.f32 %v860_v40, %v859_v35  ;;  %v469_v50 = vadd.f32 %v1643_v58, %v468_v38 }
 0x116   :  { %v716_v46 = vmax.f32 %v474_v36, 0.0  ;;  %v748_v47 = vmax.f32 %v634_v37, 0.0  ;;  %v793_v48 = vsel %vm761_vm6, %v713_v42, 0.0  ;;  %v629_v51 = vadd.f32 %v1643_v58, %v628_v39 }
 0x117   :  { %v862_v49 = vsel %vm761_vm6, %v745_v43, 0.0  ;;  %v1208_v52 = vpop.f32.mrb[20].mxu0  ;;  %v1256_v53 = vpop.f32.mrb[20].mxu1  ;;  %v864_v54 = vsel %vm761_vm6, %v746_v29, 0.0  ;;  %v794_v55 = vadd.f32 %v793_v48, %v792_v44  ;;  %v715_v61 = vmax.f32 %v469_v50, 0.0 }
 0x118   :  { %v863_v56 = vadd.f32 %v862_v49, %v861_v45  ;;  %v799_v57 = vsel %vm761_vm6, %v716_v46, 0.0  ;;  %v478_v59 = vpop.f32.mrb[21].mxu0  ;;  %v638_v60 = vpop.f32.mrb[21].mxu1  ;;  %v747_v62 = vmax.f32 %v629_v51, 0.0  ;;  %v484_v63 = vadd.f32 %v1208_v52, %v1643_v58 }
 0x119   :  { %v644_v0 = vadd.f32 %v1256_v53, %v1643_v58  ;;  %v796_v1 = vadd.f32 %v795_v41, %v794_v55  ;;  %v479_v3 = vadd.f32 %v1643_v58, %v478_v59  ;;  %v639_v4 = vadd.f32 %v1643_v58, %v638_v60 }
 0x11a   :  { %v865_v2 = vadd.f32 %v864_v54, %v863_v56  ;;  %v868_v5 = vsel %vm761_vm6, %v748_v47, 0.0  ;;  %v797_v6 = vsel %vm761_vm6, %v715_v61, 0.0  ;;  %v866_v7 = vsel %vm761_vm6, %v747_v62, 0.0 }
 0x11b   :  { %v718_v8 = vmax.f32 %v484_v63, 0.0  ;;  %v1211_v9 = vpop.f32.mrb[22].mxu0  ;;  %v1259_v10 = vpop.f32.mrb[22].mxu1  ;;  %v798_v11 = vadd.f32 %v797_v6, %v796_v1  ;;  %v717_v13 = vmax.f32 %v479_v3, 0.0  ;;  %v749_v14 = vmax.f32 %v639_v4, 0.0 }
 0x11c   :  { %v867_v12 = vadd.f32 %v866_v7, %v865_v2  ;;  %v488_v15 = vpop.f32.mrb[23].mxu0  ;;  %v648_v16 = vpop.f32.mrb[23].mxu1  ;;  %v750_v18 = vmax.f32 %v644_v0, 0.0  ;;  %v494_v19 = vadd.f32 %v1211_v9, %v1643_v58  ;;  %v654_v20 = vadd.f32 %v1259_v10, %v1643_v58 }
 0x11d   :  { %v803_v17 = vsel %vm761_vm6, %v718_v8, 0.0  ;;  %v800_v21 = vadd.f32 %v799_v57, %v798_v11  ;;  %v801_v22 = vsel %vm761_vm6, %v717_v13, 0.0  ;;  %v870_v24 = vsel %vm761_vm6, %v749_v14, 0.0 }
 0x11e   :  { %v869_v23 = vadd.f32 %v868_v5, %v867_v12  ;;  %v720_v25 = vmax.f32 %v494_v19, 0.0  ;;  %v752_v26 = vmax.f32 %v654_v20, 0.0  ;;  %v489_v27 = vadd.f32 %v1643_v58, %v488_v15 }
 0x11f   :  { %v649_v28 = vadd.f32 %v1643_v58, %v648_v16  ;;  %v1214_v29 = vpop.f32.mrb[24].mxu0  ;;  %v1262_v30 = vpop.f32.mrb[24].mxu1  ;;  %v802_v31 = vadd.f32 %v801_v22, %v800_v21  ;;  %v872_v37 = vsel %vm761_vm6, %v750_v18, 0.0 }
 0x120   :  { %v871_v32 = vadd.f32 %v870_v24, %v869_v23  ;;  %v504_v33 = vadd.f32 %v1214_v29, %v1643_v58  ;;  %v664_v34 = vadd.f32 %v1262_v30, %v1643_v58  ;;  %v498_v35 = vpop.f32.mrb[25].mxu0  ;;  %v658_v36 = vpop.f32.mrb[25].mxu1  ;;  %v807_v38 = vsel %vm761_vm6, %v720_v25, 0.0 }
 0x121   :  { %v719_v39 = vmax.f32 %v489_v27, 0.0  ;;  %v751_v40 = vmax.f32 %v649_v28, 0.0  ;;  %v876_v41 = vsel %vm761_vm6, %v752_v26, 0.0  ;;  %v804_v42 = vadd.f32 %v803_v17, %v802_v31 }
 0x122   :  { %v873_v43 = vadd.f32 %v872_v37, %v871_v32  ;;  %v722_v44 = vmax.f32 %v504_v33, 0.0  ;;  %v499_v47 = vadd.f32 %v1643_v58, %v498_v35  ;;  %v659_v48 = vadd.f32 %v1643_v58, %v658_v36 }
 0x123   :  { %v805_v45 = vsel %vm761_vm6, %v719_v39, 0.0  ;;  %v874_v46 = vsel %vm761_vm6, %v751_v40, 0.0  ;;  %v1217_v49 = vpop.f32.mrb[26].mxu0  ;;  %v1265_v50 = vpop.f32.mrb[26].mxu1  ;;  %v754_v54 = vmax.f32 %v664_v34, 0.0 }
 0x124   :  { %v806_v51 = vadd.f32 %v805_v45, %v804_v42  ;;  %v875_v52 = vadd.f32 %v874_v46, %v873_v43  ;;  %v811_v53 = vsel %vm761_vm6, %v722_v44, 0.0  ;;  %v508_v55 = vpop.f32.mrb[27].mxu0  ;;  %v668_v56 = vpop.f32.mrb[27].mxu1  ;;  %v721_v57 = vmax.f32 %v499_v47, 0.0 }
 0x125   :  { %v753_v59 = vmax.f32 %v659_v48, 0.0  ;;  %v514_v60 = vadd.f32 %v1217_v49, %v1643_v58  ;;  %v674_v61 = vadd.f32 %v1265_v50, %v1643_v58  ;;  %v509_v0 = vadd.f32 %v1643_v58, %v508_v55 }
 0x126   :  { %v808_v62 = vadd.f32 %v807_v38, %v806_v51  ;;  %v877_v63 = vadd.f32 %v876_v41, %v875_v52  ;;  %v669_v1 = vadd.f32 %v1643_v58, %v668_v56  ;;  %v809_v2 = vsel %vm761_vm6, %v721_v57, 0.0 }
 0x127   :  { %v878_v3 = vsel %vm761_vm6, %v753_v59, 0.0  ;;  %v724_v4 = vmax.f32 %v514_v60, 0.0  ;;  %v756_v5 = vmax.f32 %v674_v61, 0.0  ;;  %v1220_v6 = vpop.f32.mrb[28].mxu0  ;;  %v1268_v7 = vpop.f32.mrb[28].mxu1  ;;  %v723_v10 = vmax.f32 %v509_v0, 0.0 }
 0x128   :  { %v810_v8 = vadd.f32 %v809_v2, %v808_v62  ;;  %v879_v9 = vadd.f32 %v878_v3, %v877_v63  ;;  %v755_v11 = vmax.f32 %v669_v1, 0.0  ;;  %v518_v12 = vpop.f32.mrb[29].mxu0  ;;  %v678_v13 = vpop.f32.mrb[29].mxu1  ;;  %v880_v14 = vsel %vm761_vm6, %v754_v54, 0.0 }
 0x129   :  { %v524_v15 = vadd.f32 %v1220_v6, %v1643_v58  ;;  %v684_v16 = vadd.f32 %v1268_v7, %v1643_v58  ;;  %v813_v18 = vsel %vm761_vm6, %v723_v10, 0.0  ;;  %v815_v21 = vsel %vm761_vm6, %v724_v4, 0.0 }
 0x12a   :  { %v812_v17 = vadd.f32 %v811_v53, %v810_v8  ;;  %v881_v19 = vadd.f32 %v880_v14, %v879_v9  ;;  %v882_v20 = vsel %vm761_vm6, %v755_v11, 0.0  ;;  %v519_v23 = vadd.f32 %v1643_v58, %v518_v12  ;;  %v1090_v9 = vld [vmem:[%s1788_s5 + $0x1] ss:$0 sm:$0xff] }
 0x12b   :  { %v726_v22 = vmax.f32 %v524_v15, 0.0  ;;  %v679_v24 = vadd.f32 %v1643_v58, %v678_v13  ;;  %v1223_v25 = vpop.f32.mrb[30].mxu0  ;;  %v1271_v26 = vpop.f32.mrb[30].mxu1  ;;  %v884_v27 = vsel %vm761_vm6, %v756_v5, 0.0  ;;  %v758_v33 = vmax.f32 %v684_v16, 0.0 }
 0x12c   :  { %v814_v28 = vadd.f32 %v813_v18, %v812_v17  ;;  %v883_v29 = vadd.f32 %v882_v20, %v881_v19  ;;  %v534_v30 = vadd.f32 %v1223_v25, %v1643_v58  ;;  %v528_v31 = vpop.f32.mrb[31].mxu0  ;;  %v688_v32 = vpop.f32.mrb[31].mxu1  ;;  %v725_v34 = vmax.f32 %v519_v23, 0.0  ;;  %v1002_v20 = vld [vmem:[%s1787_s4] sm:$0x3] }
 0x12d   :  { %v757_v35 = vmax.f32 %v679_v24, 0.0  ;;  %v694_v36 = vadd.f32 %v1271_v26, %v1643_v58  ;;  %v819_v37 = vsel %vm761_vm6, %v726_v22, 0.0  ;;  %v529_v43 = vadd.f32 %v1643_v58, %v528_v31 }
 0x12e   :  { %v816_v38 = vadd.f32 %v815_v21, %v814_v28  ;;  %v885_v39 = vadd.f32 %v884_v27, %v883_v29  ;;  %v728_v40 = vmax.f32 %v534_v30, 0.0  ;;  %v817_v41 = vsel %vm761_vm6, %v725_v34, 0.0 }
 0x12f   :  { %v886_v42 = vsel %vm761_vm6, %v757_v35, 0.0  ;;  %v689_v44 = vadd.f32 %v1643_v58, %v688_v32  ;;  %v888_v47 = vsel %vm761_vm6, %v758_v33, 0.0  ;;  %v760_v48 = vmax.f32 %v694_v36, 0.0 }
 0x130   :  { %v818_v45 = vadd.f32 %v817_v41, %v816_v38  ;;  %v887_v46 = vadd.f32 %v886_v42, %v885_v39  ;;  %v727_v49 = vmax.f32 %v529_v43, 0.0  ;;  %v823_v53 = vsel %vm761_vm6, %v728_v40, 0.0 }
 0x131   :  { %v759_v50 = vmax.f32 %v689_v44, 0.0  ;;  %v892_v59 = vsel %vm761_vm6, %v760_v48, 0.0  ;;  %v1000_v17 = vstv %s1092_s25  ;;  %v920_v19 = vstv %s919_s26 }
 0x132   :  { %v820_v51 = vadd.f32 %v819_v37, %v818_v45  ;;  %v889_v52 = vadd.f32 %v888_v47, %v887_v46  ;;  %v821_v54 = vsel %vm761_vm6, %v727_v49, 0.0  ;;  %v1004_v21 = vstv %s1093_s27 }
 0x133   :  { %v890_v55 = vsel %vm761_vm6, %v759_v50, 0.0  ;;  %v1007_v22 = vstv %s1094_s28  ;;  %v1005_v25 = vmul.f32 %v1004_v21, %v1002_v20  ;;  %v1011_v27 = vstv %s1095_s29 }
 0x134   :  { %v822_v56 = vadd.f32 %v821_v54, %v820_v51  ;;  %v891_v57 = vadd.f32 %v890_v55, %v889_v52  ;;  %v1015_v31 = vstv %s1096_s8 }
 0x136   :  { %v824_v58 = vadd.f32 %v823_v53, %v822_v56  ;;  %v893_v60 = vadd.f32 %v892_v59, %v891_v57 }
 0x138   :  { %v825_v61 = vrot.slane %v824_v58, 4  ;;  %v894_v62 = vrot.slane %v893_v60, 4 }
 0x13a   :  { %v826_v63 = vadd.f32 %v825_v61, %v824_v58  ;;  %v895_v0 = vadd.f32 %v894_v62, %v893_v60 }
 0x13c   :  { %v827_v1 = vrot.slane %v826_v63, 2  ;;  %v896_v2 = vrot.slane %v895_v0, 2 }
 0x13e   :  { %v828_v3 = vadd.f32 %v827_v1, %v826_v63  ;;  %v897_v4 = vadd.f32 %v896_v2, %v895_v0 }
 0x140   :  { %v829_v5 = vrot.slane %v828_v3, 1  ;;  %v898_v6 = vrot.slane %v897_v4, 1 }
 0x142   :  { %v830_v7 = vadd.f32 %v829_v5, %v828_v3  ;;  %v899_v8 = vadd.f32 %v898_v6, %v897_v4 }
 0x144   :  { %v901_v10 = vmul.f32 0.00390625, %v830_v7  ;;  %v902_v11 = vmul.f32 0.00390625, %v899_v8 }
 0x146   :  { %v908_v12 = vmul.f32 %v1090_v9, %v902_v11  ;;  %v907_v13 = vmul.f32 %v1090_v9, %v901_v10 }
 0x148   :  { %v911_v14 = vrot.slane %v908_v12, 7  ;;  %v998_v18 = vpop.xlane.xlu1 %997 }
 0x149   :  { %v1001_v24 = vadd.f32 %v1000_v17, %v998_v18 }
 0x14a   :  { %v913_v15 = vsel %vm912_vm4, %v911_v14, %v907_v13 }
 0x14b   :  { %v916_v16 = vsel %vm915_vm7, %v913_v15, 0.0  ;;  %v1012_v29 = vmul.f32 %v1011_v27, %v1001_v24 }
 0x14c   :  { %917 = vadd.xlane.f32.xlu0 %v916_v16 }
 0x1d9   :  { %v918_v23 = vpop.xlane.xlu0 %917 }
 0x1da   :  { %v921_v26 = vadd.f32 %v920_v19, %v918_v23 }
 0x1dc   :  { %v1008_v28 = vmul.f32 %v1007_v22, %v921_v26 }
 0x1de   :  { %v1009_v30 = vadd.f32 %v1008_v28, %v1005_v25 }
 0x1e0   :  { %v1013_v32 = vadd.f32 %v1012_v29, %v1009_v30 }
 0x1e2   :  { %v1016_v33 = vadd.f32 %v1015_v31, %v1013_v32 }
 0x1e4   :  { %1018 = vst.msk [vmem:[%s1790_s7] sm:$0x3] %vm1017_vm8, %v1016_v33 }
 0x1e5   :  { %1023 = vsyncpa [#allocation3], 1 }

</bundles_post_ra>
